<compile_context>
chip_gen: v7x
topology: tpu7x:2x2x1
jax: 0.10.0
libtpu: 0.0.40
codegen_flags: <defaults>
</compile_context>

<pallas_src>
import jax
import jax.numpy as jnp
from jax.experimental import pallas as pl
from jax.experimental.pallas import tpu as pltpu


def _round_up(x, m):
    return ((x + m - 1) // m) * m


def _pick_block_b(B):
    """Batch block size: prefer 128-256-row blocks giving 4-8 grid steps
    (amortizes ~0.35us/step, engages both v7x TensorCores and DMA
    double-buffering); fall back to >=2 steps, then to one full-batch block."""
    for cand in (256, 128):
        if B % cand == 0 and B // cand >= 4:
            return cand
    for cand in (256, 128, 64, 32, 16, 8):
        if B % cand == 0 and B // cand >= 2:
            return cand
    return B


def init_qnetwork_params(key, num_inputs, num_actions, num_action_repeats, hidden_dim):
    """Master f32 parameters matching the PyTorch module's init:
       - linear1/linear2: xavier_uniform(gain=1) weights, zero bias
       - linear3: weights and bias filled with 0
    Weights are stored transposed, i.e. (in_features, out_features)."""
    def xavier_uniform(k, fan_in, fan_out):
        limit = (6.0 / (fan_in + fan_out)) ** 0.5
        return jax.random.uniform(k, (fan_in, fan_out), jnp.float32, -limit, limit)

    k1, k2 = jax.random.split(key, 2)
    d_in = num_inputs + num_actions
    return {
        "w1": xavier_uniform(k1, d_in, hidden_dim),
        "b1": jnp.zeros((hidden_dim,), jnp.float32),
        "w2": xavier_uniform(k2, hidden_dim, hidden_dim),
        "b2": jnp.zeros((hidden_dim,), jnp.float32),
        "w3": jnp.zeros((hidden_dim, num_action_repeats), jnp.float32),
        "b3": jnp.zeros((num_action_repeats,), jnp.float32),
    }


def pack_qnetwork_params(master):
    """One-time repack for the kernel: zero-pad hidden/output weight columns to
    lane multiples of 128 (for the MXU), cast weights to bf16, and pack the
    three biases into a single f32 slab (one DMA descriptor)."""
    bf16 = jnp.bfloat16
    d_in, hidden = master["w1"].shape
    out_dim = master["w3"].shape[1]
    H_pad = _round_up(hidden, 128)
    O_pad = _round_up(out_dim, 128)
    LMAX = max(H_pad, O_pad)

    w1 = jnp.zeros((d_in, H_pad), bf16).at[:, :hidden].set(master["w1"].astype(bf16))
    w2 = jnp.zeros((H_pad, H_pad), bf16).at[:hidden, :hidden].set(master["w2"].astype(bf16))
    w3 = jnp.zeros((H_pad, O_pad), bf16).at[:hidden, :out_dim].set(master["w3"].astype(bf16))

    bias = jnp.zeros((3, LMAX), jnp.float32)
    bias = bias.at[0, :hidden].set(master["b1"])
    bias = bias.at[1, :hidden].set(master["b2"])
    bias = bias.at[2, :out_dim].set(master["b3"])

    return {"w1": w1, "w2": w2, "w3": w3, "bias": bias,
            "hidden": hidden, "out_dim": out_dim, "d_in": d_in}


def qnetwork_forward(state, action, packed):
    """state: (B, num_inputs), action: (B, num_actions) -> (B, num_action_repeats)."""
    B, num_inputs = state.shape
    num_actions = action.shape[1]
    w1, w2, w3, bias = packed["w1"], packed["w2"], packed["w3"], packed["bias"]
    d_in = packed["d_in"]
    assert num_inputs + num_actions == d_in
    hidden = packed["hidden"]
    out_dim = packed["out_dim"]
    H_pad = w2.shape[0]
    O_pad = w3.shape[1]
    LMAX = bias.shape[1]

    block_b = _pick_block_b(B)
    # A non-divisible block would silently drop rows; refuse instead.
    assert B % block_b == 0, f"batch {B} not divisible by block_b {block_b}"
    grid = (B // block_b,)

    def kernel(state_ref, action_ref, w1_ref, w2_ref, w3_ref, b_ref, out_ref, xu_ref):
        bf16 = jnp.bfloat16
        f32 = jnp.float32

        # Fused concat: lay state|action side-by-side in a tiny VMEM scratch so
        # layer 1 is a single K=d_in MXU pass (matches torch.cat semantics).
        xu_ref[:, :num_inputs] = state_ref[...]
        xu_ref[:, num_inputs:] = action_ref[...]
        xu = xu_ref[...].astype(bf16)

        # Layer 1 + ReLU (f32 accumulate/epilogue; bf16 only as MXU input).
        z1 = jnp.dot(xu, w1_ref[...], preferred_element_type=f32) + b_ref[0:1, :H_pad]
        h1 = jnp.maximum(z1, 0.0).astype(bf16)

        # Layer 2 + ReLU.
        z2 = jnp.dot(h1, w2_ref[...], preferred_element_type=f32) + b_ref[1:2, :H_pad]
        h2 = jnp.maximum(z2, 0.0).astype(bf16)

        # Layer 3 (no activation): MXU dot on the lane-padded weight, then store
        # only the out_dim useful columns into the unpadded output block.
        z3 = jnp.dot(h2, w3_ref[...], preferred_element_type=f32) + b_ref[2:3, :O_pad]
        out_ref[...] = z3[:, :out_dim].astype(out_ref.dtype)

    # Advisory cost hint from true (unpadded) dims.
    flops = 2 * B * (d_in * hidden + hidden * hidden + hidden * out_dim)
    bytes_accessed = (state.size * 4 + action.size * 4
                      + (d_in * hidden + hidden * hidden + hidden * out_dim) * 2
                      + (2 * hidden + out_dim) * 4
                      + B * out_dim * 4)

    return pl.pallas_call(
        kernel,
        out_shape=jax.ShapeDtypeStruct((B, out_dim), jnp.float32),
        grid=grid,
        in_specs=[
            pl.BlockSpec((block_b, num_inputs), lambda i: (i, 0)),
            pl.BlockSpec((block_b, num_actions), lambda i: (i, 0)),
            # Grid-invariant weight/bias blocks: VMEM-resident across the batch loop.
            pl.BlockSpec((d_in, H_pad), lambda i: (0, 0)),
            pl.BlockSpec((H_pad, H_pad), lambda i: (0, 0)),
            pl.BlockSpec((H_pad, O_pad), lambda i: (0, 0)),
            pl.BlockSpec((3, LMAX), lambda i: (0, 0)),
        ],
        out_specs=pl.BlockSpec((block_b, out_dim), lambda i: (i, 0)),
        scratch_shapes=[pltpu.VMEM((block_b, d_in), jnp.float32)],
        compiler_params=pltpu.CompilerParams(dimension_semantics=("parallel",)),
        cost_estimate=pl.CostEstimate(flops=flops, transcendentals=0,
                                      bytes_accessed=bytes_accessed),
    )(state, action, w1, w2, w3, bias)


def qnetwork_reference(state, action, master):
    """Pure-JAX reference mimicking the kernel's bf16 weights + f32 accumulation."""
    bf16 = jnp.bfloat16
    f32 = jnp.float32
    xu = jnp.concatenate([state, action], axis=1).astype(bf16)
    z1 = jnp.dot(xu, master["w1"].astype(bf16), preferred_element_type=f32) + master["b1"]
    h1 = jnp.maximum(z1, 0.0).astype(bf16)
    z2 = jnp.dot(h1, master["w2"].astype(bf16), preferred_element_type=f32) + master["b2"]
    h2 = jnp.maximum(z2, 0.0).astype(bf16)
    return jnp.dot(h2, master["w3"].astype(bf16), preferred_element_type=f32) + master["b3"]


if __name__ == "__main__":
    num_inputs = 24
    num_actions = 8
    num_action_repeats = 4
    hidden_dim = 32

    key = jax.random.PRNGKey(0)
    k_state, k_action, k_params, k_w3, k_b3, k_big = jax.random.split(key, 6)

    B = 8
    state = jax.random.normal(k_state, (B, num_inputs), jnp.float32)
    action = jax.random.normal(k_action, (B, num_actions), jnp.float32)

    # 1) Module-faithful init (linear3 zeroed): output must be exactly zero.
    master = init_qnetwork_params(k_params, num_inputs, num_actions,
                                  num_action_repeats, hidden_dim)
    packed = pack_qnetwork_params(master)
    out = jax.block_until_ready(qnetwork_forward(state, action, packed))
    assert out.shape == (B, num_action_repeats)
    assert jnp.allclose(out, 0.0)

    # 2) Randomize linear3 so the full 3-layer path is exercised numerically.
    master2 = dict(master)
    master2["w3"] = 0.1 * jax.random.normal(k_w3, (hidden_dim, num_action_repeats), jnp.float32)
    master2["b3"] = 0.1 * jax.random.normal(k_b3, (num_action_repeats,), jnp.float32)
    packed2 = pack_qnetwork_params(master2)
    out2 = jax.block_until_ready(qnetwork_forward(state, action, packed2))
    ref2 = qnetwork_reference(state, action, master2)
    assert out2.shape == (B, num_action_repeats)
    assert jnp.allclose(out2, ref2, atol=1e-3, rtol=1e-3)

    # 3) Multi-step grid path (block_b=128, grid=(2,)): exercises batch tiling /
    #    megacore sharding without changing any per-row shapes.
    B_big = 256
    k_s2, k_a2 = jax.random.split(k_big)
    state_b = jax.random.normal(k_s2, (B_big, num_inputs), jnp.float32)
    action_b = jax.random.normal(k_a2, (B_big, num_actions), jnp.float32)
    out3 = jax.block_until_ready(qnetwork_forward(state_b, action_b, packed2))
    ref3 = qnetwork_reference(state_b, action_b, master2)
    assert out3.shape == (B_big, num_action_repeats)
    assert jnp.allclose(out3, ref3, atol=1e-3, rtol=1e-3)

    print("KERNEL_OK")
</pallas_src>

<mosaic_0001>
module attributes {stable_mosaic.version = 11 : i64} {
  func.func @kernel(%arg0: i32, %arg1: memref<8x24xf32, #tpu.memory_space<vmem>>, %arg2: memref<8x8xf32, #tpu.memory_space<vmem>>, %arg3: memref<32x128xbf16, #tpu.memory_space<vmem>>, %arg4: memref<128x128xbf16, #tpu.memory_space<vmem>>, %arg5: memref<128x128xbf16, #tpu.memory_space<vmem>>, %arg6: memref<3x128xf32, #tpu.memory_space<vmem>>, %arg7: memref<8x4xf32, #tpu.memory_space<vmem>>, %arg8: memref<8x32xf32, #tpu.memory_space<vmem>>) attributes {dimension_semantics = [#tpu.dimension_semantics<parallel>], iteration_bounds = array<i64: 1>, scalar_prefetch = 0 : i64, scratch_operands = 1 : i64, tpu.core_type = #tpu.core_type<tc>, window_params = [{transform_indices = @transform_0, window_bounds = array<i64: 8, 24>}, {transform_indices = @transform_1, window_bounds = array<i64: 8, 8>}, {pipeline_mode = #tpu.pipeline_mode<synchronous>, transform_indices = @transform_2, window_bounds = array<i64: 32, 128>}, {pipeline_mode = #tpu.pipeline_mode<synchronous>, transform_indices = @transform_3, window_bounds = array<i64: 128, 128>}, {pipeline_mode = #tpu.pipeline_mode<synchronous>, transform_indices = @transform_4, window_bounds = array<i64: 128, 128>}, {pipeline_mode = #tpu.pipeline_mode<synchronous>, transform_indices = @transform_5, window_bounds = array<i64: 3, 128>}, {transform_indices = @transform_6, window_bounds = array<i64: 8, 4>}]} {
    %c0 = arith.constant 0 : index
    %c0_0 = arith.constant 0 : index
    %0 = vector.load %arg1[%c0, %c0_0] : memref<8x24xf32, #tpu.memory_space<vmem>>, vector<8x24xf32>
    %c0_1 = arith.constant 0 : index
    %c0_2 = arith.constant 0 : index
    %1 = vector.load %arg8[%c0_1, %c0_2] : memref<8x32xf32, #tpu.memory_space<vmem>>, vector<8x24xf32>
    tpu.vector_store %arg8[%c0_1, %c0_2], %0 {strides = array<i32>} : memref<8x32xf32, #tpu.memory_space<vmem>>, vector<8x24xf32>,
    %c0_3 = arith.constant 0 : index
    %c0_4 = arith.constant 0 : index
    %2 = vector.load %arg2[%c0_3, %c0_4] : memref<8x8xf32, #tpu.memory_space<vmem>>, vector<8x8xf32>
    %c0_5 = arith.constant 0 : index
    %c24 = arith.constant 24 : index
    %3 = vector.load %arg8[%c0_5, %c24] : memref<8x32xf32, #tpu.memory_space<vmem>>, vector<8x8xf32>
    tpu.vector_store %arg8[%c0_5, %c24], %2 {strides = array<i32>} : memref<8x32xf32, #tpu.memory_space<vmem>>, vector<8x8xf32>,
    %c0_6 = arith.constant 0 : index
    %c0_7 = arith.constant 0 : index
    %4 = vector.load %arg8[%c0_6, %c0_7] : memref<8x32xf32, #tpu.memory_space<vmem>>, vector<8x32xf32>
    %5 = arith.truncf %4 : vector<8x32xf32> to vector<8x32xbf16>
    %c0_8 = arith.constant 0 : index
    %c0_9 = arith.constant 0 : index
    %6 = vector.load %arg3[%c0_8, %c0_9] : memref<32x128xbf16, #tpu.memory_space<vmem>>, vector<32x128xbf16>
    %cst = arith.constant dense<0.000000e+00> : vector<8x128xf32>
    %7 = tpu.matmul %5, %6, %cst {dimension_numbers = #tpu.dot_dimension_numbers<[1], [0], [0], [1], [0, 0, 1, 1], [], []>} : vector<8x32xbf16>, vector<32x128xbf16>, vector<8x128xf32> -> vector<8x128xf32>
    %c0_10 = arith.constant 0 : index
    %c0_11 = arith.constant 0 : index
    %8 = vector.load %arg6[%c0_10, %c0_11] : memref<3x128xf32, #tpu.memory_space<vmem>>, vector<1x128xf32>
    %9 = vector.broadcast %8 : vector<1x128xf32> to vector<8x128xf32>
    %10 = arith.addf %7, %9 : vector<8x128xf32>
    %cst_12 = arith.constant 0.000000e+00 : f32
    %11 = vector.broadcast %cst_12 : f32 to vector<8x128xf32>
    %12 = arith.maximumf %10, %11 : vector<8x128xf32>
    %13 = arith.truncf %12 : vector<8x128xf32> to vector<8x128xbf16>
    %c0_13 = arith.constant 0 : index
    %c0_14 = arith.constant 0 : index
    %14 = vector.load %arg4[%c0_13, %c0_14] : memref<128x128xbf16, #tpu.memory_space<vmem>>, vector<128x128xbf16>
    %cst_15 = arith.constant dense<0.000000e+00> : vector<8x128xf32>
    %15 = tpu.matmul %13, %14, %cst_15 {dimension_numbers = #tpu.dot_dimension_numbers<[1], [0], [0], [1], [0, 0, 1, 1], [], []>} : vector<8x128xbf16>, vector<128x128xbf16>, vector<8x128xf32> -> vector<8x128xf32>
    %c1 = arith.constant 1 : index
    %c0_16 = arith.constant 0 : index
    %16 = vector.load %arg6[%c1, %c0_16] : memref<3x128xf32, #tpu.memory_space<vmem>>, vector<1x128xf32>
    %17 = vector.broadcast %16 : vector<1x128xf32> to vector<8x128xf32>
    %18 = arith.addf %15, %17 : vector<8x128xf32>
    %cst_17 = arith.constant 0.000000e+00 : f32
    %19 = vector.broadcast %cst_17 : f32 to vector<8x128xf32>
    %20 = arith.maximumf %18, %19 : vector<8x128xf32>
    %21 = arith.truncf %20 : vector<8x128xf32> to vector<8x128xbf16>
    %c0_18 = arith.constant 0 : index
    %c0_19 = arith.constant 0 : index
    %22 = vector.load %arg5[%c0_18, %c0_19] : memref<128x128xbf16, #tpu.memory_space<vmem>>, vector<128x128xbf16>
    %cst_20 = arith.constant dense<0.000000e+00> : vector<8x128xf32>
    %23 = tpu.matmul %21, %22, %cst_20 {dimension_numbers = #tpu.dot_dimension_numbers<[1], [0], [0], [1], [0, 0, 1, 1], [], []>} : vector<8x128xbf16>, vector<128x128xbf16>, vector<8x128xf32> -> vector<8x128xf32>
    %c2 = arith.constant 2 : index
    %c0_21 = arith.constant 0 : index
    %24 = vector.load %arg6[%c2, %c0_21] : memref<3x128xf32, #tpu.memory_space<vmem>>, vector<1x128xf32>
    %25 = vector.broadcast %24 : vector<1x128xf32> to vector<8x128xf32>
    %26 = arith.addf %23, %25 : vector<8x128xf32>
    %27 = vector.extract_strided_slice %26 {offsets = [0, 0], sizes = [8, 4], strides = [1, 1]} : vector<8x128xf32> to vector<8x4xf32>
    %c0_22 = arith.constant 0 : index
    %c0_23 = arith.constant 0 : index
    %28 = vector.load %arg7[%c0_22, %c0_23] : memref<8x4xf32, #tpu.memory_space<vmem>>, vector<8x4xf32>
    tpu.vector_store %arg7[%c0_22, %c0_23], %27 {strides = array<i32>} : memref<8x4xf32, #tpu.memory_space<vmem>>, vector<8x4xf32>,
    return
  }
  func.func @transform_0(%arg0: i32) -> (i32, i32) {
    %c0_i32 = arith.constant 0 : i32
    %c0_i32_0 = arith.constant 0 : i32
    return %arg0, %c0_i32 : i32, i32
  }
  func.func @transform_1(%arg0: i32) -> (i32, i32) {
    %c0_i32 = arith.constant 0 : i32
    %c0_i32_0 = arith.constant 0 : i32
    return %arg0, %c0_i32 : i32, i32
  }
  func.func @transform_2(%arg0: i32) -> (i32, i32) {
    %c0_i32 = arith.constant 0 : i32
    %c0_i32_0 = arith.constant 0 : i32
    %c0_i32_1 = arith.constant 0 : i32
    return %c0_i32, %c0_i32_0 : i32, i32
  }
  func.func @transform_3(%arg0: i32) -> (i32, i32) {
    %c0_i32 = arith.constant 0 : i32
    %c0_i32_0 = arith.constant 0 : i32
    %c0_i32_1 = arith.constant 0 : i32
    return %c0_i32, %c0_i32_0 : i32, i32
  }
  func.func @transform_4(%arg0: i32) -> (i32, i32) {
    %c0_i32 = arith.constant 0 : i32
    %c0_i32_0 = arith.constant 0 : i32
    %c0_i32_1 = arith.constant 0 : i32
    return %c0_i32, %c0_i32_0 : i32, i32
  }
  func.func @transform_5(%arg0: i32) -> (i32, i32) {
    %c0_i32 = arith.constant 0 : i32
    %c0_i32_0 = arith.constant 0 : i32
    %c0_i32_1 = arith.constant 0 : i32
    return %c0_i32, %c0_i32_0 : i32, i32
  }
  func.func @transform_6(%arg0: i32) -> (i32, i32) {
    %c0_i32 = arith.constant 0 : i32
    %c0_i32_0 = arith.constant 0 : i32
    return %arg0, %c0_i32 : i32, i32
  }
}

</mosaic_0001>

<bundles_post_ra>
// kernel: tpu_custom_call.1
= control target key start
LH: loop header
LB: loop body
LE: loop exit
PB: predicated region body
PF: predicated region fallthrough
CT: control target
= control target key end

     0   :  { %11 = vsyncpa [#allocation4], 0  ;;  %s781_s0 = inlined_call_operand.hbm [shape: f32[8,24], index: 0, kind: input, shape index: {}]   ;;  %s782_s1 = inlined_call_operand.hbm [shape: f32[8,8], index: 1, kind: input, shape index: {}]   ;;  %s783_s2 = inlined_call_operand.hbm [shape: bf16[32,128], index: 2, kind: input, shape index: {}]   ;;  %s784_s3 = inlined_call_operand.hbm [shape: bf16[128,128], index: 3, kind: input, shape index: {}]   ;;  %s785_s4 = inlined_call_operand.hbm [shape: bf16[128,128], index: 4, kind: input, shape index: {}]   ;;  %s786_s5 = inlined_call_operand.vmem [shape: f32[3,128], index: 5, kind: input, shape index: {}]   ;;  %s787_s6 = inlined_call_operand.vmem [shape: f32[8,4], index: 6, kind: output, shape index: {}]  }
   0x1   :  { %12 = vsyncpa [#allocation6], 0 }
   0x2   :  { %13 = vsyncpa [#allocation9], 0  ;;  %s631_s21 = smov [#allocation5]   ;;  %s515_s25 = scalar_lea.hbm %s782_s1, 128 }
   0x3   :  { %s30_s22 = sshll.u32 %s631_s21, 4  ;;  %p516_p0 = scmp.ne.s32.totalorder %s782_s1, %s515_s25  ;;  %s31_s22 = int_to_ptr.vmem [resolvable:$true] %s30_s22 }
   0x4   :  { %p519_p1 = scmp.lt.u32.totalorder %s515_s25, %s782_s1 }
   0x6   :  { %p521_p2 = pnand %p519_p1, %p516_p0 }
   0x8   :  { %524 = shalt.err (!%p521_p2)
}
   0x9   :  { %s525_s30 = scalar_lea.vmem %s31_s22, 128  ;;  %p530_p4 = scmp.lt.s32.totalorder %s31_s22, %s31_s22 }
   0xa   :  { %p526_p3 = scmp.ne.s32.totalorder %s31_s22, %s525_s30  ;;  %p531_p5 = scmp.lt.s32.totalorder %s525_s30, %s525_s30 }
   0xc   :  { %p532_p6 = por %p531_p5, %p530_p4 }
   0xe   :  { %p533_p7 = pnand %p532_p6, %p526_p3 }
  0x10   :  { %536 = shalt.err (!%p533_p7)
}
  0x11   :  { %33 = dma.hbm_to_vmem [thread:$0]  %s782_s1, 128, %s31_s22, [#allocation6]  }
  0x12   :  { %s632_s9 = smov [#allocation8]   ;;  %s633_s11 = smov [#allocation3]  }
  0x13   :  { %s51_s10 = sshll.u32 %s632_s9, 4  ;;  %s20_s12 = sshll.u32 %s633_s11, 4  ;;  %s52_s10 = int_to_ptr.vmem [resolvable:$true] %s51_s10  ;;  %s21_s12 = int_to_ptr.vmem [resolvable:$true] %s20_s12 }
  0x14   :  { %s537_s15 = scalar_lea.hbm %s784_s3, 1024 }
  0x15   :  { %p538_p8 = scmp.ne.s32.totalorder %s784_s3, %s537_s15  ;;  %p541_p9 = scmp.lt.u32.totalorder %s537_s15, %s784_s3 }
  0x17   :  { %p543_p10 = pnand %p541_p9, %p538_p8 }
  0x19   :  { %546 = shalt.err (!%p543_p10)
}
  0x1a   :  { %s547_s1 = scalar_lea.vmem %s52_s10, 1024  ;;  %p552_p12 = scmp.lt.s32.totalorder %s52_s10, %s52_s10 }
  0x1b   :  { %p548_p11 = scmp.ne.s32.totalorder %s52_s10, %s547_s1  ;;  %p553_p13 = scmp.lt.s32.totalorder %s547_s1, %s547_s1 }
  0x1d   :  { %p554_p0 = por %p553_p13, %p552_p12 }
  0x1f   :  { %p555_p1 = pnand %p554_p0, %p548_p11 }
  0x21   :  { %558 = shalt.err (!%p555_p1)
}
  0x22   :  { %s634_s20 = smov 64   ;;  %s635_s21 = smov 4  }
  0x23   :  { %57 = dma.hbm_to_vmem [thread:$0]  %s784_s3, 1024, %s52_s10, [#allocation9], %s634_s20, %s634_s20, %s635_s21  }
  0x24   :  { %s559_s26 = scalar_lea.hbm %s781_s0, 128 }
  0x25   :  { %p560_p2 = scmp.ne.s32.totalorder %s781_s0, %s559_s26  ;;  %p563_p3 = scmp.lt.u32.totalorder %s559_s26, %s781_s0 }
  0x27   :  { %p565_p4 = pnand %p563_p3, %p560_p2 }
  0x29   :  { %568 = shalt.err (!%p565_p4)
}
  0x2a   :  { %s569_s7 = scalar_lea.vmem %s21_s12, 128  ;;  %p574_p6 = scmp.lt.s32.totalorder %s21_s12, %s21_s12 }
  0x2b   :  { %p570_p5 = scmp.ne.s32.totalorder %s21_s12, %s569_s7  ;;  %p575_p7 = scmp.lt.s32.totalorder %s569_s7, %s569_s7 }
  0x2d   :  { %p576_p8 = por %p575_p7, %p574_p6 }
  0x2f   :  { %p577_p9 = pnand %p576_p8, %p570_p5 }
  0x31   :  { %580 = shalt.err (!%p577_p9)
}
  0x32   :  { %23 = dma.hbm_to_vmem [thread:$0]  %s781_s0, 128, %s21_s12, [#allocation4]  }
  0x33   :  { %s636_s9 = smov [#allocation7]   ;;  %s637_s11 = smov [#allocation10]  }
  0x34   :  { %s39_s10 = sshll.u32 %s636_s9, 4  ;;  %s63_s13 = sshll.u32 %s637_s11, 4  ;;  %s40_s10 = int_to_ptr.vmem [resolvable:$true] %s39_s10  ;;  %s64_s13 = int_to_ptr.vmem [resolvable:$true] %s63_s13 }
  0x35   :  { %s581_s16 = scalar_lea.hbm %s783_s2, 256 }
  0x36   :  { %p582_p10 = scmp.ne.s32.totalorder %s783_s2, %s581_s16  ;;  %p585_p11 = scmp.lt.u32.totalorder %s581_s16, %s783_s2 }
  0x38   :  { %p587_p12 = pnand %p585_p11, %p582_p10 }
  0x3a   :  { %590 = shalt.err (!%p587_p12)
}
  0x3b   :  { %s591_s0 = scalar_lea.vmem %s40_s10, 256  ;;  %p596_p0 = scmp.lt.s32.totalorder %s40_s10, %s40_s10 }
  0x3c   :  { %p592_p13 = scmp.ne.s32.totalorder %s40_s10, %s591_s0  ;;  %p597_p1 = scmp.lt.s32.totalorder %s591_s0, %s591_s0 }
  0x3e   :  { %p598_p2 = por %p597_p1, %p596_p0 }
  0x40   :  { %p599_p3 = pnand %p598_p2, %p592_p13 }
  0x42   :  { %602 = shalt.err (!%p599_p3)
}
  0x43   :  { %45 = dma.hbm_to_vmem [thread:$0]  %s783_s2, 256, %s40_s10, [#allocation6], %s634_s20, %s634_s20, %s635_s21  }
  0x44   :  { %s603_s25 = scalar_lea.hbm %s785_s4, 1024 }
  0x45   :  { %p604_p4 = scmp.ne.s32.totalorder %s785_s4, %s603_s25  ;;  %p607_p5 = scmp.lt.u32.totalorder %s603_s25, %s785_s4 }
  0x47   :  { %p609_p6 = pnand %p607_p5, %p604_p4 }
  0x49   :  { %612 = shalt.err (!%p609_p6)
}
  0x4a   :  { %s613_s30 = scalar_lea.vmem %s64_s13, 1024  ;;  %p618_p8 = scmp.lt.s32.totalorder %s64_s13, %s64_s13 }
  0x4b   :  { %p614_p7 = scmp.ne.s32.totalorder %s64_s13, %s613_s30  ;;  %p619_p9 = scmp.lt.s32.totalorder %s613_s30, %s613_s30 }
  0x4d   :  { %p620_p10 = por %p619_p9, %p618_p8 }
  0x4f   :  { %p621_p11 = pnand %p620_p10, %p614_p7 }
  0x51   :  { %624 = shalt.err (!%p621_p11)
}
  0x52   :  { %69 = dma.hbm_to_vmem [thread:$0]  %s785_s4, 1024, %s64_s13, [#allocation9], %s634_s20, %s634_s20, %s635_s21  }
  0x53   :  { %625 = dma.done.wait [#allocation4], 128  }
  0x54   :  { %626 = vsyncadd [#allocation4], 4294967168 }
  0x55   :  { %627 = dma.done.wait [#allocation6], 384  }
  0x56   :  { %628 = vsyncadd [#allocation6], 4294966912 }
  0x57   :  { %629 = dma.done.wait [#allocation9], 2048  }
  0x58   :  { %630 = vsyncadd [#allocation9], 4294965248  ;;  %v638_v0 = vmov 0.0   ;;  %vm639_vm0 = vmmov 0   ;;  %vm89_vm1 = vcmask 195584   ;;  %v91_v1 = vld [vmem:[#allocation5] sm:$0xff] }
  0x59   :  { %439 = vmatprep.subr.bf16.mxu0 %v638_v0  ;;  %447 = vmatprep.subr.bf16.mxu1 %v638_v0  ;;  %v88_v2 = vld [vmem:[#allocation3] sm:$0xff]  ;;  %s640_s4 = smov 24   ;;  %v497_v3 = vld [vmem:[#allocation7] sm:$0xff]   ;;  %v498_v4 = vld [vmem:[#allocation7 + $0x8] sm:$0xff]   ;;  %vm96_vm2 = vcmask 261312   ;;  %vm121_vm3 = vcmask 261120  }
  0x5a   :  { %443 = vmatprep.mubr.msk.bf16.mxu0 %vm639_vm0, %v638_v0  ;;  %463 = vmatprep.mubr.msk.bf16.mxu1 %vm639_vm0, %v638_v0  ;;  %90 = vst.msk [vmem:[#allocation2] sm:$0xff] %vm89_vm1, %v88_v2  ;;  %v499_v5 = vld [vmem:[#allocation8] sm:$0xff]   ;;  %v500_v6 = vld [vmem:[#allocation8 + $0x8] sm:$0xff]   ;;  %v501_v7 = vld [vmem:[#allocation8 + $0x10] sm:$0xff]   ;;  %vm387_vm4 = vcmask 31744  }
  0x5b   :  { %93 = vrot.lane.b32.xlu0 %v91_v1, %s640_s4  ;;  %440 = vmatpush3.bf16.msra.mxu0 %v497_v3  ;;  %v502_v8 = vld [vmem:[#allocation8 + $0x18] sm:$0xff]   ;;  %v503_v9 = vld [vmem:[#allocation8 + $0x20] sm:$0xff]   ;;  %v504_v10 = vld [vmem:[#allocation8 + $0x28] sm:$0xff]  }
  0x5c   :  { %441 = vmatprep.subr.bf16.mxu0 %v638_v0  ;;  %448 = vmatpush3.bf16.msra.mxu1 %v499_v5  ;;  %v505_v14 = vld [vmem:[#allocation8 + $0x30] sm:$0xff]   ;;  %v506_v15 = vld [vmem:[#allocation8 + $0x38] sm:$0xff]   ;;  %v507_v16 = vld [vmem:[#allocation10] sm:$0xff]  }
  0x5d   :  { %449 = vmatprep.subr.bf16.mxu1 %v638_v0  ;;  %v508_v17 = vld [vmem:[#allocation10 + $0x8] sm:$0xff]   ;;  %v509_v18 = vld [vmem:[#allocation10 + $0x10] sm:$0xff]   ;;  %v510_v19 = vld [vmem:[#allocation10 + $0x18] sm:$0xff]  }
  0x5e   :  { %v511_v20 = vld [vmem:[#allocation10 + $0x20] sm:$0xff]   ;;  %v512_v21 = vld [vmem:[#allocation10 + $0x28] sm:$0xff]   ;;  %v396_v22 = vld [vmem:[%s786_s5] ss:$0 sm:$0xff] }
  0x5f   :  { %442 = vmatpush3.bf16.msra.mxu0 %v498_v4  ;;  %v513_v30 = vld [vmem:[#allocation10 + $0x30] sm:$0xff]   ;;  %v514_v31 = vld [vmem:[#allocation10 + $0x38] sm:$0xff]  }
  0x60   :  { %467 = vmatprep.subr.bf16.mxu0 %v638_v0  ;;  %450 = vmatpush3.bf16.msra.mxu1 %v500_v6  ;;  %v400_v32 = vld [vmem:[%s786_s5 + $0x1] ss:$0 sm:$0xff]  ;;  %v409_v40 = vld [vmem:[%s786_s5 + $0x2] ss:$0 sm:$0xff] }
  0x61   :  { %451 = vmatprep.subr.bf16.mxu1 %v638_v0 }
  0x64   :  { %452 = vmatpush3.bf16.msra.mxu1 %v501_v7 }
  0x65   :  { %453 = vmatprep.subr.bf16.mxu1 %v638_v0 }
  0x68   :  { %454 = vmatpush3.bf16.msra.mxu1 %v502_v8 }
  0x69   :  { %455 = vmatprep.subr.bf16.mxu1 %v638_v0 }
  0x6c   :  { %456 = vmatpush3.bf16.msra.mxu1 %v503_v9 }
  0x6d   :  { %457 = vmatprep.subr.bf16.mxu1 %v638_v0 }
  0x70   :  { %458 = vmatpush3.bf16.msra.mxu1 %v504_v10 }
  0x71   :  { %459 = vmatprep.subr.bf16.mxu1 %v638_v0 }
  0x74   :  { %460 = vmatpush3.bf16.msra.mxu1 %v505_v14 }
  0x75   :  { %461 = vmatprep.subr.bf16.mxu1 %v638_v0 }
  0x78   :  { %462 = vmatpush3.bf16.msra.mxu1 %v506_v15 }
  0xcd   :  { %v94_v11 = vpop.permute.xlu0 %93 }
  0xce   :  { %97 = vst.msk [vmem:[#allocation2] sm:$0xff] %vm96_vm2, %v94_v11 }
  0xd5   :  { %v98_v12 = vld [vmem:[#allocation2] sm:$0xff] }
  0xd6   :  { %v99_v13 = vpack.c.bf16 %v98_v12, %v98_v12 }
  0xd8   :  { %444 = vmatmul.mubr.msk.bf16.vlgmr.msra.gmra.mrb[0].mxu0 %vm121_vm3, %v99_v13 }
  0xd9   :  { %483 = vmatprep.mubr.msk.bf16.mxu0 %vm639_vm0, %v638_v0  ;;  %468 = vmatpush3.bf16.msra.mxu0 %v507_v16 }
  0xda   :  { %469 = vmatprep.subr.bf16.mxu0 %v638_v0 }
  0xdd   :  { %470 = vmatpush3.bf16.msra.mxu0 %v508_v17 }
  0xde   :  { %471 = vmatprep.subr.bf16.mxu0 %v638_v0 }
  0xe1   :  { %472 = vmatpush3.bf16.msra.mxu0 %v509_v18 }
  0xe2   :  { %473 = vmatprep.subr.bf16.mxu0 %v638_v0 }
  0xe5   :  { %474 = vmatpush3.bf16.msra.mxu0 %v510_v19 }
  0xe6   :  { %475 = vmatprep.subr.bf16.mxu0 %v638_v0 }
  0xe9   :  { %476 = vmatpush3.bf16.msra.mxu0 %v511_v20 }
  0xea   :  { %477 = vmatprep.subr.bf16.mxu0 %v638_v0 }
  0xed   :  { %478 = vmatpush3.bf16.msra.mxu0 %v512_v21 }
  0xee   :  { %479 = vmatprep.subr.bf16.mxu0 %v638_v0 }
  0xf1   :  { %480 = vmatpush3.bf16.msra.mxu0 %v513_v30 }
  0xf2   :  { %481 = vmatprep.subr.bf16.mxu0 %v638_v0 }
  0xf5   :  { %482 = vmatpush3.bf16.msra.mxu0 %v514_v31 }
 0x1ab   :  { %v159_v23 = vpop.f32.mrb[0].mxu0 }
 0x1ac   :  { %v160_v24 = vadd.f32 %v396_v22, %v159_v23  ;;  %v445_v25 = vpop.f32.mrb[1].mxu0 }
 0x1ad   :  { %v162_v26 = vpop.f32.mrb[2].mxu0 }
 0x1ae   :  { %v165_v27 = vmax.f32 %v160_v24, 0.0  ;;  %v446_v28 = vpop.f32.mrb[3].mxu0 }
 0x1b0   :  { %v166_v29 = vpack.c.bf16 %v165_v27, %v165_v27 }
 0x1b2   :  { %464 = vmatmul.mubr.bf16.vlgmr.msra.gmra.mrb[0].mxu1 %v166_v29 }
 0x285   :  { %v270_v33 = vpop.f32.mrb[0].mxu1 }
 0x286   :  { %v271_v34 = vadd.f32 %v400_v32, %v270_v33  ;;  %v465_v35 = vpop.f32.mrb[1].mxu1 }
 0x287   :  { %v273_v36 = vpop.f32.mrb[2].mxu1 }
 0x288   :  { %v276_v37 = vmax.f32 %v271_v34, 0.0  ;;  %v466_v38 = vpop.f32.mrb[3].mxu1 }
 0x28a   :  { %v277_v39 = vpack.c.bf16 %v276_v37, %v276_v37 }
 0x28c   :  { %484 = vmatmul.mubr.bf16.vlgmr.msra.gmra.mrb[4].mxu0 %v277_v39 }
 0x35f   :  { %v381_v41 = vpop.f32.mrb[4].mxu0 }
 0x360   :  { %v382_v42 = vadd.f32 %v409_v40, %v381_v41  ;;  %v485_v43 = vpop.f32.mrb[5].mxu0 }
 0x361   :  { %v384_v44 = vpop.f32.mrb[6].mxu0 }
 0x362   :  { %388 = vst.msk [vmem:[%s787_s6] sm:$0xff] %vm387_vm4, %v382_v42  ;;  %v486_v45 = vpop.f32.mrb[7].mxu0 }
 0x363   :  { %393 = vsyncpa [#allocation4], 1 }
 0x364   :  { %394 = vsyncpa [#allocation6], 1 }
 0x365   :  { %395 = vsyncpa [#allocation9], 1 }

</bundles_post_ra>
